<compile_context>
chip_gen: v5e
topology: v5e:2x2
jax: 0.10.0
libtpu: 0.0.40
codegen_flags: <defaults>
</compile_context>

<pallas_src>
import jax
import jax.numpy as jnp
from jax.experimental import pallas as pl
from jax.experimental.pallas import tpu as pltpu


def _learnable_sigmoid_kernel(slope_ref, x_ref, o_ref):
    # Elementwise hot path on the VPU/EUP.  bf16 inputs stay bf16
    # (v6e/v7x have bf16 VPU/EUP); everything else computes in f32.
    compute_dtype = jnp.bfloat16 if x_ref.dtype == jnp.bfloat16 else jnp.float32
    x = x_ref[...].astype(compute_dtype)
    slope = slope_ref[...].astype(compute_dtype)      # (1, F) -> broadcast over rows
    # 1.2 / (1 + exp(-u)) == 0.6 + 0.6 * tanh(0.5 * u): one EUP op, exact.
    y = 0.6 + 0.6 * jnp.tanh(0.5 * (slope * x))
    o_ref[...] = y.astype(o_ref.dtype)


def learnable_sigmoid(x, slope, *, row_tile=1024):
    """y = 1.2 / (1 + exp(-slope * x)), slope broadcast along the last axis."""
    orig_shape = x.shape
    F = orig_shape[-1]
    assert slope.shape == (F,), f"slope must have shape ({F},), got {slope.shape}"

    # Flatten leading dims to rows (free reshape for contiguous x).
    x2d = x.reshape(-1, F)
    R = x2d.shape[0]

    # Row tile: as large as requested, no bigger than needed, multiple of 8
    # (f32 sublane).  No wrapper-side padding: Pallas pads the ragged last
    # block on read and masks the write.
    rt = max(8, min(row_tile, R))
    rt = ((rt + 7) // 8) * 8
    # Guarantee >= 2 grid steps when possible so dimension_semantics
    # ("parallel",) can shard rows across both v7x TensorCores.
    if R > 8:
        half = ((pl.cdiv(R, 2) + 7) // 8) * 8
        rt = min(rt, half)

    grid = (pl.cdiv(R, rt),)

    itemsize = jnp.dtype(x.dtype).itemsize
    cost = pl.CostEstimate(
        flops=3 * R * F,                       # mul, mul, add (tanh counted below)
        transcendentals=R * F,                 # one tanh per element
        bytes_accessed=(2 * R * F + F) * itemsize,
    )

    out = pl.pallas_call(
        _learnable_sigmoid_kernel,
        out_shape=jax.ShapeDtypeStruct((R, F), x.dtype),
        grid_spec=pltpu.PrefetchScalarGridSpec(
            num_scalar_prefetch=0,
            grid=grid,
            in_specs=[
                # slope: same (1, F) block for every grid step (stays resident)
                pl.BlockSpec((1, F), lambda i: (0, 0)),
                # x: one row-tile per grid step, full feature width
                pl.BlockSpec((rt, F), lambda i: (i, 0)),
            ],
            out_specs=pl.BlockSpec((rt, F), lambda i: (i, 0)),
        ),
        compiler_params=pltpu.CompilerParams(
            dimension_semantics=("parallel",),   # rows shard over 2 TCs on v7x
        ),
        cost_estimate=cost,
    )(slope.reshape(1, F), x2d)

    return out.reshape(orig_shape)


if __name__ == "__main__":
    key = jax.random.PRNGKey(0)
    k_x, k_s, k_x2, k_x3 = jax.random.split(key, 4)

    in_features = 257                      # module default
    batch, seq = 2, 8
    x = jax.random.normal(k_x, (batch, seq, in_features), dtype=jnp.float32)

    # Module init is torch.ones(in_features); perturb slightly so the
    # broadcast path is actually exercised.
    slope = jnp.ones((in_features,), dtype=jnp.float32) + \
        0.1 * jax.random.normal(k_s, (in_features,), dtype=jnp.float32)

    y = learnable_sigmoid(x, slope)
    y = jax.block_until_ready(y)
    ref = 1.2 / (1.0 + jnp.exp(-slope * x))
    assert y.shape == x.shape
    assert jnp.allclose(y, ref, atol=1e-5, rtol=1e-5)

    # Ragged row count (R = 3*5 = 15, not a multiple of the tile) to exercise
    # the padded-read / masked-write last block and the 2-step grid split.
    x2 = jax.random.normal(k_x2, (3, 5, in_features), dtype=jnp.float32)
    y2 = jax.block_until_ready(learnable_sigmoid(x2, slope))
    ref2 = 1.2 / (1.0 + jnp.exp(-slope * x2))
    assert y2.shape == x2.shape
    assert jnp.allclose(y2, ref2, atol=1e-5, rtol=1e-5)

    # bf16 activation path (computes natively in bf16 on v6e/v7x).
    x3 = jax.random.normal(k_x3, (4, in_features), dtype=jnp.bfloat16)
    y3 = jax.block_until_ready(learnable_sigmoid(x3, slope))
    ref3 = 1.2 / (1.0 + jnp.exp(-slope * x3.astype(jnp.float32)))
    assert y3.shape == x3.shape
    assert jnp.allclose(y3.astype(jnp.float32), ref3, atol=5e-2, rtol=5e-2)

    print("KERNEL_OK")
</pallas_src>

<mosaic_0001>
module attributes {stable_mosaic.version = 11 : i64} {
  func.func @_learnable_sigmoid_kernel(%arg0: i32, %arg1: memref<1x257xf32, #tpu.memory_space<vmem>>, %arg2: memref<8x257xf32, #tpu.memory_space<vmem>>, %arg3: memref<8x257xf32, #tpu.memory_space<vmem>>) attributes {dimension_semantics = [#tpu.dimension_semantics<parallel>], iteration_bounds = array<i64: 2>, scalar_prefetch = 0 : i64, scratch_operands = 0 : i64, tpu.core_type = #tpu.core_type<tc>, window_params = [{pipeline_mode = #tpu.pipeline_mode<synchronous>, transform_indices = @transform_0, window_bounds = array<i64: 1, 257>}, {transform_indices = @transform_1, window_bounds = array<i64: 8, 257>}, {transform_indices = @transform_2, window_bounds = array<i64: 8, 257>}]} {
    %c0 = arith.constant 0 : index
    %c0_0 = arith.constant 0 : index
    %0 = vector.load %arg2[%c0, %c0_0] : memref<8x257xf32, #tpu.memory_space<vmem>>, vector<8x257xf32>
    %c0_1 = arith.constant 0 : index
    %c0_2 = arith.constant 0 : index
    %1 = vector.load %arg1[%c0_1, %c0_2] : memref<1x257xf32, #tpu.memory_space<vmem>>, vector<1x257xf32>
    %2 = vector.broadcast %1 : vector<1x257xf32> to vector<8x257xf32>
    %3 = arith.mulf %2, %0 : vector<8x257xf32>
    %cst = arith.constant 5.000000e-01 : f32
    %4 = vector.broadcast %cst : f32 to vector<8x257xf32>
    %5 = arith.mulf %4, %3 : vector<8x257xf32>
    %6 = math.tanh %5 : vector<8x257xf32>
    %cst_3 = arith.constant 6.000000e-01 : f32
    %7 = vector.broadcast %cst_3 : f32 to vector<8x257xf32>
    %8 = arith.mulf %7, %6 : vector<8x257xf32>
    %cst_4 = arith.constant 6.000000e-01 : f32
    %9 = vector.broadcast %cst_4 : f32 to vector<8x257xf32>
    %10 = arith.addf %9, %8 : vector<8x257xf32>
    %c0_5 = arith.constant 0 : index
    %c0_6 = arith.constant 0 : index
    %11 = vector.load %arg3[%c0_5, %c0_6] : memref<8x257xf32, #tpu.memory_space<vmem>>, vector<8x257xf32>
    tpu.vector_store %arg3[%c0_5, %c0_6], %10 {strides = array<i32>} : memref<8x257xf32, #tpu.memory_space<vmem>>, vector<8x257xf32>,
    return
  }
  func.func @transform_0(%arg0: i32) -> (i32, i32) {
    %c0_i32 = arith.constant 0 : i32
    %c0_i32_0 = arith.constant 0 : i32
    %c0_i32_1 = arith.constant 0 : i32
    return %c0_i32, %c0_i32_0 : i32, i32
  }
  func.func @transform_1(%arg0: i32) -> (i32, i32) {
    %c0_i32 = arith.constant 0 : i32
    %c0_i32_0 = arith.constant 0 : i32
    return %arg0, %c0_i32 : i32, i32
  }
  func.func @transform_2(%arg0: i32) -> (i32, i32) {
    %c0_i32 = arith.constant 0 : i32
    %c0_i32_0 = arith.constant 0 : i32
    return %arg0, %c0_i32 : i32, i32
  }
}

</mosaic_0001>

<bundles_post_ra>
// kernel: tpu_custom_call.1
= control target key start
LH: loop header
LB: loop body
LE: loop exit
PB: predicated region body
PF: predicated region fallthrough
CT: control target
= control target key end

     0   :  { %7 = vsyncpa [#allocation3], 0  ;;  %s669_s0 = inlined_call_operand.hbm [shape: f32[1,257], index: 0, kind: input, shape index: {}]   ;;  %s670_s1 = inlined_call_operand.hbm [shape: f32[16,257], index: 1, kind: input, shape index: {}]   ;;  %s671_s2 = inlined_call_operand.hbm [shape: f32[16,257], index: 2, kind: output, shape index: {}]  }
   0x1   :  { %8 = vsyncpa [#allocation6], 0 }
   0x2   :  { %10 = vsyncpa [#allocation6 + $0x1], 0 }
   0x3   :  { %11 = vsyncpa [#allocation4], 0 }
   0x4   :  { %13 = vsyncpa [#allocation4 + $0x1], 0  ;;  %s531_s9 = smov 0   ;;  %s533_s10 = smov 0  }
   0x5   :  { %s535_s11 = smov 0   ;;  %s537_s12 = smov 0  }
   0x6 LB: > { %s552_s13 = sadd.s32 4294967295, %s513_s12   ;;  %s306_s14 = sadd.s32 4294967294, %s513_s12   ;;  %s513_s12 = sphi %s537_s12, %s681_s12   ;;  %s509_s11 = sphi %s535_s11, %s680_s11   ;;  %s505_s10 = sphi %s533_s10, %s679_s10   ;;  %s501_s9 = sphi %s531_s9, %s678_s9  }
   0x7   : > { %p60_p0 = scmp.ne.s32.totalorder %s505_s10, %s501_s9  ;;  %p61_p1 = scmp.eq.s32.totalorder %s552_s13, 0 }
   0x8   : > { %p84_p2 = scmp.eq.s32.totalorder %s552_s13, 1  ;;  %p90_p3 = scmp.eq.s32.totalorder %s306_s14, 1 }
   0x9   : > { %p561_p4 = por %p61_p1, %p60_p0  ;;  %p307_p5 = scmp.ge.s32.totalorder %s513_s12, 1 }
   0xa   : > { %p566_p6 = por %p90_p3, %p60_p0  ;;  %p97_p7 = scmp.lt.s32.totalorder %s513_s12, 3 }
   0xb   : > { %s109_s19 = sshll.u32 %s669_s0, 4  ;;  %s515_s21 = smov [#allocation2]   ;;  %s110_s19 = int_to_ptr.hbm [resolvable:$true] %s109_s19 }
   0xc   : > { %p574_p8 = pnand %p307_p5, %p97_p7  ;;  %s111_s22 = sshll.u32 %s515_s21, 4  ;;  %s112_s22 = int_to_ptr.vmem [resolvable:$true] %s111_s22 }
   0xd   : > { %s584_s23 = sadd.s32 1, %s513_s12   ;;  %s47_s24 = sadd.s32 1, %s509_s11 }
   0xe   : > { %p328_p10 = pneg %p574_p8  ;;  %s44_s25 = ssub.s32 %s513_s12, %s584_s23 }
   0xf   : > { %p45_p12 = scmp.eq.s32.totalorder %s44_s25, 0  ;;  %p54_p13 = scmp.ne.s32.totalorder %s509_s11, %s505_s10 }
  0x10   : > { %p329_p11 = pnand %p328_p10, %p61_p1  ;;  %p55_p0 = scmp.eq.s32.totalorder %s513_s12, 0 }
  0x11   : > { %p341_p3 = scmp.lt.s32.totalorder %s513_s12, 2  ;;  %p598_p7 = por %p84_p2, %p54_p13 }
  0x12   : > { %331 = dma.hbm_to_vmem [thread:$0]  (!%p329_p11), %s110_s19, 48, %s112_s22, [#allocation3]  }
  0x13   : > { %s594_s26 = scalar_select %p45_p12, %s509_s11, %s47_s24  }
  0x14   : > { %p56_p5 = por %p55_p0, %p54_p13  ;;  %s122_s28 = sand.u32 1, %s509_s11  }
  0x15   : > { %s317_s29 = smul.u32 24, %s513_s12  ;;  %s123_s17 = scalar_lea.sflag [#allocation6], %s122_s28 }
  0x16   : > { %s316_s30 = smul.u32 24, %s122_s28  ;;  %p607_p10 = pnand %p341_p3, %p56_p5 }
  0x17   : > { %s131_s5 = scalar_lea.hbm %s670_s1, %s317_s29  ;;  %s420_s24 = scalar_lea.hbm %s670_s1, 48 }
  0x18   : > { %s133_s7 = sshll.u32 %s131_s5, 4  ;;  %s126_s8 = scalar_lea.vmem [#allocation5], %s316_s30  ;;  %s134_s7 = int_to_ptr.hbm [resolvable:$true] %s133_s7 }
  0x19   : > { %s135_s14 = sshll.u32 %s126_s8, 4  ;;  %s413_s18 = sshra.s32 %s134_s7, 4  ;;  %s136_s14 = int_to_ptr.vmem [resolvable:$true] %s135_s14  ;;  %s414_s18 = int_to_ptr.hbm [resolvable:$true] %s413_s18 }
  0x1a   : > { %s415_s19 = scalar_lea.hbm %s414_s18, 24  ;;  %p417_p11 = pneg %p607_p10 }
  0x1b   : > { %p416_p2 = scmp.ne.s32.totalorder %s414_s18, %s415_s19  ;;  %p421_p0 = scmp.lt.s32.totalorder %s414_s18, %s670_s1 }
  0x1c   : > { %p422_p3 = scmp.lt.s32.totalorder %s420_s24, %s415_s19 }
  0x1d   : > { %p418_p12 = pnand %p417_p11, %p416_p2 }
  0x1e   : > { %p423_p5 = por %p422_p3, %p421_p0 }
  0x1f   : > { %p419_p13 = pneg %p418_p12 }
  0x21   : > { %p424_p9 = pnand %p423_p5, %p419_p13 }
  0x23   : > { %427 = shalt.err (!%p424_p9)
}
  0x24   : > { %335 = dma.hbm_to_vmem [thread:$0]  (!%p607_p10), %s134_s7, 384, %s136_s14, %s123_s17  }
  0x25   : > { %144 = sbr.rel (%p574_p8) target bundleno = 72 (0x48), region = 28 }
  0x2a   : > { %488 = dma.done.wait (%p61_p1), [#allocation3], 48  }
  0x2b   : > { %490 = vsyncadd (%p61_p1), [#allocation3], 4294967248  ;;  %s628_s28 = sand.u32 1, %s505_s10  }
  0x2c   : > { %s318_s30 = smul.u32 24, %s628_s28  ;;  %s152_s3 = scalar_lea.sflag [#allocation6], %s628_s28 }
  0x2e   : > { %s155_s4 = scalar_lea.vmem [#allocation5], %s318_s30 }
  0x2f   : > { %492 = dma.done.wait (%p561_p4), %s152_s3, 384  }
  0x30   : > { %494 = vsyncadd (%p561_p4), %s152_s3, 4294966912  ;;  %v177_v0 = vld [vmem:[%s155_s4] sm:$0xff]  ;;  %v178_v2 = vld [vmem:[%s155_s4 + $0x8] sm:$0xff]  ;;  %s319_s20 = smul.u32 24, %s552_s13  ;;  %s176_s7 = scalar_lea.vmem [#allocation7], %s318_s30  ;;  %vm205_vm0 = vcmask 7168  }
  0x31   : > { %v180_v1 = vld [vmem:[#allocation2] sm:$0x7]  ;;  %v179_v5 = vld [vmem:[%s155_s4 + $0x10] sm:$0xff]  ;;  %s221_s8 = sshll.u32 %s176_s7, 4  ;;  %s208_s13 = scalar_lea.sflag [#allocation4], %s628_s28  ;;  %s222_s8 = int_to_ptr.vmem [resolvable:$true] %s221_s8 }
  0x32   : > { %v182_v3 = vperm.slane %v180_v1, 0  ;;  %v183_v4 = vperm.slane %v180_v1, 1  ;;  %v184_v6 = vperm.slane %v180_v1, 2  ;;  %s219_s6 = scalar_lea.hbm %s671_s2, %s319_s20  ;;  %s463_s22 = scalar_lea.hbm %s671_s2, 48 }
  0x33   : > { %s223_s14 = sshll.u32 %s219_s6, 4  ;;  %s224_s14 = int_to_ptr.hbm [resolvable:$true] %s223_s14 }
  0x34   : > { %v188_v7 = vmul.f32 %v182_v3, %v177_v0  ;;  %v189_v8 = vmul.f32 %v183_v4, %v178_v2  ;;  %v190_v9 = vmul.f32 %v184_v6, %v179_v5  ;;  %s457_s17 = sshra.s32 %s224_s14, 4  ;;  %s458_s17 = int_to_ptr.hbm [resolvable:$true] %s457_s17 }
  0x35   : > { %s459_s18 = scalar_lea.hbm %s458_s17, 24  ;;  %p464_p9 = scmp.lt.s32.totalorder %s458_s17, %s671_s2 }
  0x36   : > { %v191_v10 = vmul.f32 0.5, %v188_v7  ;;  %v192_v11 = vmul.f32 0.5, %v189_v8  ;;  %v193_v12 = vmul.f32 0.5, %v190_v9  ;;  %p460_p1 = scmp.ne.s32.totalorder %s458_s17, %s459_s18  ;;  %p465_p10 = scmp.lt.s32.totalorder %s463_s22, %s459_s18 }
  0x38   : > { %377 = vtanh.f32 %v191_v10  ;;  %p461_p4 = pnand %p460_p1, %p598_p7  ;;  %p466_p2 = por %p465_p10, %p464_p9 }
  0x39   : > { %379 = vtanh.f32 %v192_v11 }
  0x3a   : > { %381 = vtanh.f32 %v193_v12  ;;  %p462_p8 = pneg %p461_p4 }
  0x3c   : > { %p467_p11 = pnand %p466_p2, %p462_p8 }
  0x3e   : > { %v378_v13 = vpop.eup %377 }
  0x3f   : > { %v380_v14 = vpop.eup %379  ;;  %v197_v15 = vmul.f32 0.6, %v378_v13 }
  0x40   : > { %v382_v16 = vpop.eup %381  ;;  %v198_v17 = vmul.f32 0.6, %v380_v14 }
  0x41   : > { %v200_v18 = vadd.f32 0.6, %v197_v15  ;;  %v199_v19 = vmul.f32 0.6, %v382_v16 }
  0x42   : > { %v201_v20 = vadd.f32 0.6, %v198_v17 }
  0x43   : > { %203 = vst [vmem:[%s176_s7] sm:$0xff] %v200_v18  ;;  %v202_v21 = vadd.f32 0.6, %v199_v19 }
  0x44   : > { %204 = vst [vmem:[%s176_s7 + $0x8] sm:$0xff] %v201_v20 }
  0x45   : > { %206 = vst.msk [vmem:[%s176_s7 + $0x10] sm:$0xff] %vm205_vm0, %v202_v21 }
  0x46   : > { %470 = shalt.err (!%p467_p11)
}
  0x47   : > { %326 = dma.vmem_to_hbm [thread:$0]  (%p598_p7), %s222_s8, 384, %s224_s14, %s208_s13  }
  0x48 PF: > { %s235_s29 = sand.u32 1, %s501_s9   ;;  %p677_p12 = scmp.ge.s32.totalorder %s513_s12, 2 }
  0x49   : > { %s236_s28 = scalar_lea.sflag [#allocation4], %s235_s29 }
  0x4a   : > { %p337_p13 = pnand %p677_p12, %p566_p6 }
  0x4c   : > { %p338_p0 = pneg %p337_p13 }
  0x4e   : > { %496 = dma.done.wait (%p338_p0), %s236_s28, 384  }
  0x4f   : > { %498 = vsyncadd (%p338_p0), %s236_s28, 4294966912  ;;  %p16_p3 = scmp.ge.s32.totalorder %s584_s23, 4   ;;  %s678_s9 = smov %s505_s10 }
  0x50   : > { %s679_s10 = smov %s509_s11  ;;  %s680_s11 = smov %s594_s26 }
  0x51   : > { %s681_s12 = smov %s584_s23  ;;  %18 = sbr.rel (!%p16_p3) target bundleno = 6 (0x6), region = 78 }
  0x56   :  { %242 = vsyncpa [#allocation3], 1 }
  0x57   :  { %244 = vsyncpa [#allocation3 + $0x1], 1 }
  0x58   :  { %245 = vsyncpa [#allocation6], 1 }
  0x59   :  { %247 = vsyncpa [#allocation6 + $0x1], 1 }
  0x5a   :  { %248 = vsyncpa [#allocation4], 1 }
  0x5b   :  { %250 = vsyncpa [#allocation4 + $0x1], 1 }

</bundles_post_ra>
